<compile_context>
chip_gen: v7x
topology: tpu7x:2x2x1
jax: 0.10.0
libtpu: 0.0.40
codegen_flags: <defaults>
</compile_context>

<pallas_src>
import functools

import jax
import jax.numpy as jnp
from jax.experimental import pallas as pl
from jax.experimental.pallas import tpu as pltpu


_VMEM_LIMIT_BYTES = 32 * 1024 * 1024   # safe on v5e/v6e (128 MiB phys) and v7x (64 MiB)
_TILE_VMEM_BUDGET = 24 * 1024 * 1024   # budget used when sizing the row tile


def _round_up(x: int, m: int) -> int:
    return (x + m - 1) // m * m


def _pick_tile_n(n_rows, k, t_pad, in_itemsize, out_itemsize, sublane,
                 vmem_budget_bytes=_TILE_VMEM_BUDGET):
    """Largest row-tile (multiple of the sublane packing) that fits the VMEM budget,
    capped at 512 rows, while keeping >= 2 grid steps when N is large enough."""
    # Double-buffered inputs + output, plus f32 compute temporaries per row.
    per_row = 2 * (k * t_pad * in_itemsize + t_pad * out_itemsize) + 6 * t_pad * 4
    cap = max(sublane, (vmem_budget_bytes // per_row) // sublane * sublane)
    tile = min(512, cap)

    n_up = _round_up(n_rows, sublane)
    if n_up <= tile:
        tile = n_up
        # Split into (at least) two grid steps so both v7x TensorCores get work.
        if n_up >= 2 * sublane:
            tile = _round_up(pl.cdiv(n_rows, 2), sublane)
    return tile


def _combine_softmax_kernel(alpha_ref, sims_ref, out_ref, *,
                            num_mats, use_softmax, valid_t):
    # alpha_ref: SMEM (K,) float32 combination weights
    # sims_ref : VMEM (K, tile_n, T_pad) stacked similarity tiles
    # out_ref  : VMEM (tile_n, T_pad) combined (and softmax-ed) similarity tile
    acc = alpha_ref[0] * sims_ref[0].astype(jnp.float32)
    for k in range(1, num_mats):           # K is tiny (~2): unrolled VPU FMA, no MXU
        acc = acc + alpha_ref[k] * sims_ref[k].astype(jnp.float32)

    if use_softmax:
        t_pad = acc.shape[-1]
        if valid_t != t_pad:
            # Mask the lane-padding columns so they contribute exp(-inf) = 0.
            col = jax.lax.broadcasted_iota(jnp.int32, acc.shape, dimension=1)
            acc = jnp.where(col < valid_t, acc, -jnp.inf)
        m = jnp.max(acc, axis=-1, keepdims=True)
        e = jnp.exp(acc - m)
        denom = jnp.sum(e, axis=-1, keepdims=True)
        # Exact divide: the approx EUP reciprocal broke row normalization (>1e-4).
        acc = e / denom

    out_ref[...] = acc.astype(out_ref.dtype)


def combine_similarities(sims, alpha, *, softmax=True, tile_n=None):
    """sims: (K, N, T) stacked similarity matrices; alpha: (K,) weights."""
    K, N, T = sims.shape
    alpha = jnp.asarray(alpha, dtype=jnp.float32)      # never downcast the combine

    in_itemsize = jnp.dtype(sims.dtype).itemsize
    out_itemsize = in_itemsize
    sublane = 8 * (4 // in_itemsize)                   # f32 -> 8, bf16 -> 16, int8 -> 32

    T_pad = _round_up(T, 128)                          # lane-dense output slab
    if tile_n is None:
        tile_n = _pick_tile_n(N, K, T_pad, in_itemsize, out_itemsize, sublane)
    else:
        tile_n = _round_up(tile_n, sublane)
    N_pad = _round_up(N, tile_n)

    if (N_pad, T_pad) != (N, T):
        sims = jnp.pad(sims, ((0, 0), (0, N_pad - N), (0, T_pad - T)))

    kernel = functools.partial(
        _combine_softmax_kernel, num_mats=K, use_softmax=softmax, valid_t=T)

    out = pl.pallas_call(
        kernel,
        out_shape=jax.ShapeDtypeStruct((N_pad, T_pad), sims.dtype),
        grid=(N_pad // tile_n,),
        in_specs=[
            # tiny weight vector lives in SMEM, read as scalars
            pl.BlockSpec(memory_space=pltpu.MemorySpace.SMEM),
            # one row-tile of every similarity matrix at a time
            pl.BlockSpec((K, tile_n, T_pad), lambda i: (0, i, 0)),
        ],
        out_specs=pl.BlockSpec((tile_n, T_pad), lambda i: (i, 0)),
        compiler_params=pltpu.CompilerParams(
            dimension_semantics=("parallel",),
            vmem_limit_bytes=_VMEM_LIMIT_BYTES,
        ),
    )(alpha, sims)

    return out[:N, :T]


def _reference(sims, alpha, softmax=True):
    combined = jnp.einsum("k,knt->nt", alpha.astype(jnp.float32),
                          sims.astype(jnp.float32))
    if softmax:
        combined = jax.nn.softmax(combined, axis=-1)
    return combined.astype(sims.dtype)


if __name__ == "__main__":
    key = jax.random.PRNGKey(0)
    # Two similarity matrices; N and T deliberately NOT multiples of 8/128 so the
    # padding + lane-masking path is exercised.
    K, N, T = 2, 200, 150

    k1, _ = jax.random.split(key)
    sims = jax.random.uniform(k1, (K, N, T), dtype=jnp.float32)

    # Deterministic combination weights (softmax-normalized constants).
    alpha = jax.nn.softmax(jnp.arange(K, dtype=jnp.float32))

    # softmax=True (module default)
    out = combine_similarities(sims, alpha, softmax=True)
    out = jax.block_until_ready(out)
    ref = _reference(sims, alpha, softmax=True)
    assert out.shape == (N, T)
    assert jnp.allclose(out, ref, atol=1e-5, rtol=1e-5), "softmax mismatch vs reference"
    assert jnp.allclose(out.sum(-1), 1.0, atol=1e-4), "softmax rows not normalized"

    # softmax=False (pure weighted combine)
    out_ns = jax.block_until_ready(combine_similarities(sims, alpha, softmax=False))
    ref_ns = _reference(sims, alpha, softmax=False)
    assert jnp.allclose(out_ns, ref_ns, atol=1e-5, rtol=1e-5), "combine mismatch vs reference"

    print("KERNEL_OK")
</pallas_src>

<mosaic_0001>
module attributes {stable_mosaic.version = 11 : i64} {
  func.func @_combine_softmax_kernel(%arg0: i32, %arg1: memref<2xf32, #tpu.memory_space<smem>>, %arg2: memref<2x104x256xf32, #tpu.memory_space<vmem>>, %arg3: memref<104x256xf32, #tpu.memory_space<vmem>>) attributes {dimension_semantics = [#tpu.dimension_semantics<parallel>], iteration_bounds = array<i64: 2>, scalar_prefetch = 0 : i64, scratch_operands = 0 : i64, tpu.core_type = #tpu.core_type<tc>, window_params = [{transform_indices = @transform_0, window_bounds = array<i64: 2>}, {transform_indices = @transform_1, window_bounds = array<i64: 2, 104, 256>}, {transform_indices = @transform_2, window_bounds = array<i64: 104, 256>}]} {
    %c0 = arith.constant 0 : index
    %0 = memref.load %arg1[%c0] : memref<2xf32, #tpu.memory_space<smem>>
    %c0_0 = arith.constant 0 : index
    %c0_1 = arith.constant 0 : index
    %c0_2 = arith.constant 0 : index
    %1 = vector.load %arg2[%c0_0, %c0_1, %c0_2] : memref<2x104x256xf32, #tpu.memory_space<vmem>>, vector<1x104x256xf32>
    %2 = vector.shape_cast %1 : vector<1x104x256xf32> to vector<104x256xf32>
    %3 = vector.broadcast %0 : f32 to vector<104x256xf32>
    %4 = arith.mulf %3, %2 : vector<104x256xf32>
    %c1 = arith.constant 1 : index
    %5 = memref.load %arg1[%c1] : memref<2xf32, #tpu.memory_space<smem>>
    %c1_3 = arith.constant 1 : index
    %c0_4 = arith.constant 0 : index
    %c0_5 = arith.constant 0 : index
    %6 = vector.load %arg2[%c1_3, %c0_4, %c0_5] : memref<2x104x256xf32, #tpu.memory_space<vmem>>, vector<1x104x256xf32>
    %7 = vector.shape_cast %6 : vector<1x104x256xf32> to vector<104x256xf32>
    %8 = vector.broadcast %5 : f32 to vector<104x256xf32>
    %9 = arith.mulf %8, %7 : vector<104x256xf32>
    %10 = arith.addf %4, %9 : vector<104x256xf32>
    %11 = tpu.iota {dimensions = array<i32: 1>} : vector<104x256xi32>
    %c150_i32 = arith.constant 150 : i32
    %12 = vector.broadcast %c150_i32 : i32 to vector<104x256xi32>
    %13 = arith.cmpi slt, %11, %12 : vector<104x256xi32>
    %cst = arith.constant 0xFF800000 : f32
    %14 = vector.broadcast %cst : f32 to vector<104x256xf32>
    %15 = arith.select %13, %10, %14 : vector<104x256xi1>, vector<104x256xf32>
    %cst_6 = arith.constant dense<0xFF800000> : vector<104xf32>
    %16 = vector.multi_reduction <maximumf>, %15, %cst_6 [1] : vector<104x256xf32> to vector<104xf32>
    %17 = vector.shape_cast %16 : vector<104xf32> to vector<104x1xf32>
    %18 = vector.broadcast %17 : vector<104x1xf32> to vector<104x256xf32>
    %19 = arith.subf %15, %18 : vector<104x256xf32>
    %20 = math.exp %19 : vector<104x256xf32>
    %cst_7 = arith.constant dense<0.000000e+00> : vector<104xf32>
    %21 = vector.multi_reduction <add>, %20, %cst_7 [1] : vector<104x256xf32> to vector<104xf32>
    %22 = vector.shape_cast %21 : vector<104xf32> to vector<104x1xf32>
    %23 = vector.broadcast %22 : vector<104x1xf32> to vector<104x256xf32>
    %24 = arith.divf %20, %23 : vector<104x256xf32>
    %c0_8 = arith.constant 0 : index
    %c0_9 = arith.constant 0 : index
    %25 = vector.load %arg3[%c0_8, %c0_9] : memref<104x256xf32, #tpu.memory_space<vmem>>, vector<104x256xf32>
    tpu.vector_store %arg3[%c0_8, %c0_9], %24 {strides = array<i32>} : memref<104x256xf32, #tpu.memory_space<vmem>>, vector<104x256xf32>,
    return
  }
  func.func @transform_0(%arg0: i32) -> i32 {
    %c0_i32 = arith.constant 0 : i32
    %c0_i32_0 = arith.constant 0 : i32
    return %c0_i32 : i32
  }
  func.func @transform_1(%arg0: i32) -> (i32, i32, i32) {
    %c0_i32 = arith.constant 0 : i32
    %c0_i32_0 = arith.constant 0 : i32
    %c0_i32_1 = arith.constant 0 : i32
    return %c0_i32, %arg0, %c0_i32_0 : i32, i32, i32
  }
  func.func @transform_2(%arg0: i32) -> (i32, i32) {
    %c0_i32 = arith.constant 0 : i32
    %c0_i32_0 = arith.constant 0 : i32
    return %arg0, %c0_i32 : i32, i32
  }
}

</mosaic_0001>

<bundles_post_ra>
// kernel: tpu_custom_call.1
= control target key start
LH: loop header
LB: loop body
LE: loop exit
PB: predicated region body
PF: predicated region fallthrough
CT: control target
= control target key end

     0   :  { %7 = vsyncpa [#allocation5], 0  ;;  %s1540_s0 = inlined_call_operand.hbm [shape: f32[2], index: 0, kind: input, shape index: {}]   ;;  %s1541_s1 = inlined_call_operand.hbm [shape: f32[2,208,256], index: 1, kind: input, shape index: {}]   ;;  %s1542_s2 = inlined_call_operand.hbm [shape: f32[208,256], index: 2, kind: output, shape index: {}]  }
   0x1   :  { %8 = vsyncpa [#allocation3], 0 }
   0x2   :  { %10 = vsyncpa [#allocation3 + $0x1], 0 }
   0x3   :  { %11 = vsyncpa [#allocation4], 0 }
   0x4   :  { %13 = vsyncpa [#allocation4 + $0x1], 0  ;;  %s994_s9 = smov 0   ;;  %s996_s10 = smov 0  }
   0x5   :  { %s998_s11 = smov 0   ;;  %s1000_s12 = smov 0  }
   0x6 LB: > { %s1015_s13 = sadd.s32 4294967295, %s967_s12   ;;  %s689_s14 = sadd.s32 4294967294, %s967_s12   ;;  %s967_s12 = sphi %s1000_s12, %s1551_s12   ;;  %s963_s11 = sphi %s998_s11, %s1550_s11   ;;  %s959_s10 = sphi %s996_s10, %s1549_s10   ;;  %s955_s9 = sphi %s994_s9, %s1548_s9  }
   0x7   : > { %s1019_s15 = sadd.s32 1, %s967_s12   ;;  %s47_s16 = sadd.s32 1, %s963_s11 }
   0x8   : > { %s44_s17 = ssub.s32 %s967_s12, %s1019_s15  ;;  %p54_p0 = scmp.ne.s32.totalorder %s963_s11, %s959_s10 }
   0x9   : > { %p45_p1 = scmp.eq.s32.totalorder %s44_s17, 0  ;;  %p55_p2 = scmp.eq.s32.totalorder %s967_s12, 0 }
   0xa   : > { %p60_p3 = scmp.ne.s32.totalorder %s959_s10, %s955_s9  ;;  %p61_p4 = scmp.eq.s32.totalorder %s1015_s13, 0 }
   0xb   : > { %s1031_s18 = scalar_select %p45_p1, %s963_s11, %s47_s16  }
   0xc   : > { %p1033_p5 = por %p55_p2, %p54_p0  ;;  %p1039_p6 = por %p61_p4, %p60_p3 }
   0xd   : > { %p84_p7 = scmp.eq.s32.totalorder %s1015_s13, 1  ;;  %p90_p8 = scmp.eq.s32.totalorder %s689_s14, 1 }
   0xe   : > { %p690_p9 = scmp.ge.s32.totalorder %s967_s12, 1  ;;  %p97_p10 = scmp.lt.s32.totalorder %s967_s12, 3 }
   0xf   : > { %p1046_p11 = por %p84_p7, %p54_p0  ;;  %p1050_p12 = por %p90_p8, %p60_p3 }
  0x10   : > { %p1054_p13 = pnand %p690_p9, %p97_p10  ;;  %s884_s26 = scalar_lea.hbm %s1540_s0, 16 }
  0x11   : > { %p885_p0 = scmp.ne.s32.totalorder %s1540_s0, %s884_s26  ;;  %p891_p9 = scmp.lt.u32.totalorder %s884_s26, %s1540_s0 }
  0x12   : > { %p754_p1 = pneg %p1054_p13 }
  0x14   : > { %p755_p2 = pnand %p754_p1, %p61_p4 }
  0x16   : > { %p886_p3 = pneg %p755_p2 }
  0x18   : > { %p887_p7 = pnand %p886_p3, %p885_p0 }
  0x1a   : > { %p888_p8 = pneg %p887_p7 }
  0x1c   : > { %p893_p10 = pnand %p891_p9, %p888_p8 }
  0x1e   : > { %896 = shalt.err (!%p893_p10)
}
  0x1f   : > { %s969_s3 = smov [#allocation2]   ;;  %p692_p1 = scmp.ge.s32.totalorder %s967_s12, 2 }
  0x20   : > { %757 = dma.hbm_to_smem (!%p755_p2), %s1540_s0, 16, %s969_s3, [#allocation5]  }
  0x21   : > { %115 = sbr.rel (%p692_p1) target bundleno = 54 (0x36), region = 20 }
  0x28   : > { %s119_s6 = sand.u32 1, %s963_s11   ;;  %s734_s7 = smul.u32 3328, %s967_s12 }
  0x29   : > { %s736_s8 = smul.u32 416, %s119_s6  ;;  %s970_s14 = smov 6656  }
  0x2a   : > { %742 = sst [smem:[#allocation9]] (%p1033_p5), %s970_s14  ;;  %s130_s25 = scalar_lea.hbm %s1541_s1, %s734_s7 }
  0x2b   : > { %s741_s16 = scalar_select %p1033_p5, [#allocation0], [#allocation10] }
  0x2c   : > { %s123_s27 = scalar_lea.vmem [#allocation6], %s736_s8  ;;  %s971_s29 = smov 3328  }
  0x2d   : > { %s135_s26 = sld [smem:[%s741_s16]]   ;;  %s143_s28 = sshll.u32 %s123_s27, 4  ;;  %s144_s28 = int_to_ptr.vmem [resolvable:$true] %s143_s28 }
  0x2e   : > { %743 = sst [smem:[#allocation9 + $0x1]] (%p1033_p5), %s971_s29  ;;  %s972_s30 = smov 13  }
  0x2f   : > { %744 = sst [smem:[#allocation9 + $0x2]] (%p1033_p5), %s972_s30  ;;  %s973_s3 = smov 256  }
  0x30   : > { %745 = sst [smem:[#allocation9 + $0x3]] (%p1033_p5), %s973_s3  ;;  %s974_s4 = smov 16  }
  0x31   : > { %746 = sst [smem:[#allocation9 + $0x4]] (%p1033_p5), %s973_s3  ;;  %s120_s8 = scalar_lea.sflag [#allocation3], %s119_s6 }
  0x32   : > { %747 = sst [smem:[#allocation9 + $0x5]] (%p1033_p5), %s974_s4  ;;  %s975_s14 = smov [#allocation8]  }
  0x33   : > { %s695_s5 = sshll.u32 %s135_s26, 26 }
  0x34   : > { %s696_s7 = sadd.s32 134217728, %s695_s5 }
  0x35   : > { %748 = dma.general (%p1033_p5), %s130_s25, 6656, %s144_s28, %s120_s8, %s975_s14, [#allocation9], %s696_s7, 0  }
  0x36 PF: > { %168 = sbr.rel (%p1054_p13) target bundleno = 439 (0x1b7), region = 28 }
  0x3d   : > { %942 = dma.done.wait (%p61_p4), [#allocation5], 16  }
  0x3e   : > { %944 = vsyncadd (%p61_p4), [#allocation5], 4294967280  ;;  %s1105_s16 = sand.u32 1, %s959_s10  }
  0x3f   : > { %s737_s6 = smul.u32 416, %s1105_s16  ;;  %s175_s17 = scalar_lea.sflag [#allocation3], %s1105_s16 }
  0x41   : > { %s1109_s19 = scalar_lea.vmem [#allocation6], %s737_s6 }
  0x42   : > { %946 = dma.done.wait (%p1039_p6), %s175_s17, 6656  }
  0x43   : > { %948 = vsyncadd (%p1039_p6), %s175_s17, 4294960640 }
  0x44   : > { %183 = sfence }
  0x45   : > { %s202_s23 = sld [smem:[#allocation2]]  ;;  %s699_s24 = sld [smem:[#allocation2 + $0x1]]  ;;  %v337_v0 = vlaneseq  ;;  %v203_v2 = vld [vmem:[%s1109_s19] sm:$0xff]  ;;  %v204_v3 = vld [vmem:[%s1109_s19 + $0x8] sm:$0xff]  ;;  %v700_v4 = vld [vmem:[%s1109_s19 + $0xd0] sm:$0xff] }
  0x46   : > { %v701_v5 = vld [vmem:[%s1109_s19 + $0xd8] sm:$0xff]  ;;  %v207_v7 = vld [vmem:[%s1109_s19 + $0x20] sm:$0xff]  ;;  %v208_v8 = vld [vmem:[%s1109_s19 + $0x28] sm:$0xff]  ;;  %s738_s20 = smul.u32 208, %s1105_s16  ;;  %s590_s30 = scalar_lea.sflag [#allocation4], %s1105_s16 }
  0x47   : > { %v338_v1 = vand.u32 127, %v337_v0  ;;  %v704_v9 = vld [vmem:[%s1109_s19 + $0xf0] sm:$0xff]  ;;  %v705_v10 = vld [vmem:[%s1109_s19 + $0xf8] sm:$0xff]  ;;  %v702_v19 = vld [vmem:[%s1109_s19 + $0xe0] sm:$0xff]  ;;  %s735_s26 = smul.u32 3328, %s1015_s13  ;;  %s976_s4 = smov [#allocation7]  }
  0x48   : > { %v205_v13 = vld [vmem:[%s1109_s19 + $0x10] sm:$0xff]  ;;  %v206_v14 = vld [vmem:[%s1109_s19 + $0x18] sm:$0xff]  ;;  %v703_v20 = vld [vmem:[%s1109_s19 + $0xe8] sm:$0xff]  ;;  %s1437_s25 = scalar_lea.vmem [#allocation7], %s738_s20  ;;  %s901_s5 = sshll.u32 %s976_s4, 4  ;;  %s902_s5 = int_to_ptr.vmem [resolvable:$false] %s901_s5 }
  0x49   : > { %v1119_v6 = vadd.s32 128, %v338_v1  ;;  %v209_v25 = vld [vmem:[%s1109_s19 + $0x30] sm:$0xff]  ;;  %v210_v26 = vld [vmem:[%s1109_s19 + $0x38] sm:$0xff]  ;;  %v706_v27 = vld [vmem:[%s1109_s19 + $0x100] sm:$0xff]  ;;  %s604_s27 = sshll.u32 %s1437_s25, 4  ;;  %s1488_s29 = scalar_lea.hbm %s1542_s2, %s735_s26  ;;  %s1490_s27 = int_to_ptr.vmem [resolvable:$true] %s604_s27 }
  0x4a   : > { %v707_v36 = vld [vmem:[%s1109_s19 + $0x108] sm:$0xff]  ;;  %v211_v37 = vld [vmem:[%s1109_s19 + $0x40] sm:$0xff]  ;;  %v708_v43 = vld [vmem:[%s1109_s19 + $0x110] sm:$0xff]  ;;  %s897_s3 = scalar_lea.vmem %s1490_s27, 3328  ;;  %s903_s7 = scalar_lea.vmem %s902_s5, 6656 }
  0x4b   : > { %v1125_v11 = vstv %s202_s23  ;;  %v1127_v12 = vstv %s699_s24  ;;  %vm341_vm0 = vcmp.lt.s32.totalorder %v1119_v6, 150  ;;  %v212_v42 = vld [vmem:[%s1109_s19 + $0x48] sm:$0xff]  ;;  %v709_v44 = vld [vmem:[%s1109_s19 + $0x118] sm:$0xff]  ;;  %p898_p4 = scmp.ne.s32.totalorder %s1490_s27, %s897_s3  ;;  %p904_p13 = scmp.lt.s32.totalorder %s1490_s27, %s902_s5 }
  0x4c   : > { %v230_v15 = vmul.f32 %v1125_v11, %v203_v2  ;;  %v231_v16 = vmul.f32 %v1125_v11, %v204_v3  ;;  %v285_v17 = vmul.f32 %v700_v4, %v1127_v12  ;;  %v286_v18 = vmul.f32 %v701_v5, %v1127_v12  ;;  %v213_v49 = vld [vmem:[%s1109_s19 + $0x50] sm:$0xff]  ;;  %v214_v50 = vld [vmem:[%s1109_s19 + $0x58] sm:$0xff]  ;;  %v710_v55 = vld [vmem:[%s1109_s19 + $0x120] sm:$0xff]  ;;  %p905_p2 = scmp.lt.s32.totalorder %s903_s7, %s897_s3 }
  0x4d   : > { %v234_v21 = vmul.f32 %v1125_v11, %v207_v7  ;;  %v235_v22 = vmul.f32 %v1125_v11, %v208_v8  ;;  %v289_v23 = vmul.f32 %v704_v9, %v1127_v12  ;;  %v290_v24 = vmul.f32 %v705_v10, %v1127_v12  ;;  %v711_v56 = vld [vmem:[%s1109_s19 + $0x128] sm:$0xff]  ;;  %v215_v61 = vld [vmem:[%s1109_s19 + $0x60] sm:$0xff]  ;;  %v712_v63 = vld [vmem:[%s1109_s19 + $0x130] sm:$0xff]  ;;  %p899_p5 = pnand %p898_p4, %p1046_p11 }
  0x4e   : > { %v1145_v28 = vadd.f32 %v285_v17, %v230_v15  ;;  %v312_v29 = vadd.f32 %v286_v18, %v231_v16  ;;  %v232_v30 = vmul.f32 %v1125_v11, %v205_v13  ;;  %v233_v31 = vmul.f32 %v1125_v11, %v206_v14  ;;  %v216_v62 = vld [vmem:[%s1109_s19 + $0x68] sm:$0xff]  ;;  %v713_v9 = vld [vmem:[%s1109_s19 + $0x138] sm:$0xff]  ;;  %v217_v10 = vld [vmem:[%s1109_s19 + $0x70] sm:$0xff]  ;;  %p906_p0 = por %p905_p2, %p904_p13 }
  0x4f   : > { %v1149_v32 = vadd.f32 %v289_v23, %v234_v21  ;;  %v316_v33 = vadd.f32 %v290_v24, %v235_v22  ;;  %v287_v34 = vmul.f32 %v702_v19, %v1127_v12  ;;  %v288_v35 = vmul.f32 %v703_v20, %v1127_v12  ;;  %v218_v17 = vld [vmem:[%s1109_s19 + $0x78] sm:$0xff]  ;;  %v714_v18 = vld [vmem:[%s1109_s19 + $0x140] sm:$0xff]  ;;  %v715_v19 = vld [vmem:[%s1109_s19 + $0x148] sm:$0xff]  ;;  %p900_p6 = pneg %p899_p5 }
  0x50   : > { %v1157_v38 = vsel %vm341_vm0, %v312_v29, -inf  ;;  %v236_v39 = vmul.f32 %v1125_v11, %v209_v25  ;;  %v237_v40 = vmul.f32 %v1125_v11, %v210_v26  ;;  %v291_v41 = vmul.f32 %v706_v27, %v1127_v12  ;;  %v219_v24 = vld [vmem:[%s1109_s19 + $0x80] sm:$0xff]  ;;  %v220_v25 = vld [vmem:[%s1109_s19 + $0x88] sm:$0xff] }
  0x51   : > { %v368_v45 = vmax.f32 %v1145_v28, %v1157_v38  ;;  %v1169_v46 = vsel %vm341_vm0, %v316_v33, -inf  ;;  %v1171_v47 = vadd.f32 %v287_v34, %v232_v30  ;;  %v314_v48 = vadd.f32 %v288_v35, %v233_v31  ;;  %v716_v31 = vld [vmem:[%s1109_s19 + $0x150] sm:$0xff]  ;;  %v717_v33 = vld [vmem:[%s1109_s19 + $0x158] sm:$0xff]  ;;  %p907_p3 = pnand %p906_p0, %p900_p6 }
  0x52   : > { %v374_v51 = vmax.f32 %v1149_v32, %v1169_v46  ;;  %v292_v52 = vmul.f32 %v707_v36, %v1127_v12  ;;  %v1178_v53 = vadd.f32 %v291_v41, %v236_v39  ;;  %v238_v54 = vmul.f32 %v1125_v11, %v211_v37  ;;  %v221_v39 = vld [vmem:[%s1109_s19 + $0x90] sm:$0xff]  ;;  %v718_v41 = vld [vmem:[%s1109_s19 + $0x160] sm:$0xff] }
  0x53   : > { %369 = vmax.xlane.f32.xlu0 %v368_v45  ;;  %v1185_v57 = vsel %vm341_vm0, %v314_v48, -inf  ;;  %v239_v58 = vmul.f32 %v1125_v11, %v212_v42  ;;  %v293_v59 = vmul.f32 %v708_v43, %v1127_v12  ;;  %v294_v60 = vmul.f32 %v709_v44, %v1127_v12 }
  0x54   : > { %375 = vmax.xlane.f32.xlu1 %v374_v51  ;;  %v371_v0 = vmax.f32 %v1171_v47, %v1185_v57  ;;  %v318_v1 = vadd.f32 %v292_v52, %v237_v40  ;;  %v240_v2 = vmul.f32 %v1125_v11, %v213_v49  ;;  %v241_v3 = vmul.f32 %v1125_v11, %v214_v50  ;;  %v222_v40 = vld [vmem:[%s1109_s19 + $0x98] sm:$0xff]  ;;  %v719_v52 = vld [vmem:[%s1109_s19 + $0x168] sm:$0xff] }
  0x55   : > { %v1197_v4 = vadd.f32 %v293_v59, %v238_v54  ;;  %v320_v5 = vadd.f32 %v294_v60, %v239_v58  ;;  %v295_v7 = vmul.f32 %v710_v55, %v1127_v12  ;;  %v296_v8 = vmul.f32 %v711_v56, %v1127_v12  ;;  %v223_v54 = vld [vmem:[%s1109_s19 + $0xa0] sm:$0xff]  ;;  %v224_v60 = vld [vmem:[%s1109_s19 + $0xa8] sm:$0xff] }
  0x56   : > { %v1205_v13 = vsel %vm341_vm0, %v318_v1, -inf  ;;  %v242_v14 = vmul.f32 %v1125_v11, %v215_v61  ;;  %v243_v15 = vmul.f32 %v1125_v11, %v216_v62  ;;  %v297_v16 = vmul.f32 %v712_v63, %v1127_v12  ;;  %v720_v61 = vld [vmem:[%s1109_s19 + $0x170] sm:$0xff]  ;;  %v721_v62 = vld [vmem:[%s1109_s19 + $0x178] sm:$0xff] }
  0x57   : > { %372 = vmax.xlane.f32.xlu0 %v371_v0  ;;  %v377_v20 = vmax.f32 %v1178_v53, %v1205_v13  ;;  %v1217_v21 = vsel %vm341_vm0, %v320_v5, -inf  ;;  %v1219_v22 = vadd.f32 %v295_v7, %v240_v2  ;;  %v322_v23 = vadd.f32 %v296_v8, %v241_v3  ;;  %v225_v3 = vld [vmem:[%s1109_s19 + $0xb0] sm:$0xff]  ;;  %v226_v5 = vld [vmem:[%s1109_s19 + $0xb8] sm:$0xff] }
  0x58   : > { %v380_v26 = vmax.f32 %v1197_v4, %v1217_v21  ;;  %v298_v27 = vmul.f32 %v713_v9, %v1127_v12  ;;  %v1226_v29 = vadd.f32 %v297_v16, %v242_v14  ;;  %v244_v30 = vmul.f32 %v1125_v11, %v217_v10  ;;  %v722_v14 = vld [vmem:[%s1109_s19 + $0x180] sm:$0xff] }
  0x59   : > { %378 = vmax.xlane.f32.xlu1 %v377_v20  ;;  %v1233_v34 = vsel %vm341_vm0, %v322_v23, -inf  ;;  %v245_v35 = vmul.f32 %v1125_v11, %v218_v17  ;;  %v299_v36 = vmul.f32 %v714_v18, %v1127_v12  ;;  %v300_v37 = vmul.f32 %v715_v19, %v1127_v12  ;;  %v227_v20 = vld [vmem:[%s1109_s19 + $0xc0] sm:$0xff]  ;;  %v228_v23 = vld [vmem:[%s1109_s19 + $0xc8] sm:$0xff] }
  0x5a   : > { %v383_v42 = vmax.f32 %v1219_v22, %v1233_v34  ;;  %v324_v43 = vadd.f32 %v298_v27, %v243_v15  ;;  %v246_v44 = vmul.f32 %v1125_v11, %v219_v24  ;;  %v247_v45 = vmul.f32 %v1125_v11, %v220_v25  ;;  %v723_v15 = vld [vmem:[%s1109_s19 + $0x188] sm:$0xff]  ;;  %v724_v24 = vld [vmem:[%s1109_s19 + $0x190] sm:$0xff] }
  0x5b   : > { %381 = vmax.xlane.f32.xlu0 %v380_v26  ;;  %v1245_v48 = vadd.f32 %v299_v36, %v244_v30  ;;  %v326_v49 = vadd.f32 %v300_v37, %v245_v35  ;;  %v301_v50 = vmul.f32 %v716_v31, %v1127_v12  ;;  %v302_v51 = vmul.f32 %v717_v33, %v1127_v12  ;;  %v725_v37 = vld [vmem:[%s1109_s19 + $0x198] sm:$0xff] }
  0x5c   : > { %v1253_v55 = vsel %vm341_vm0, %v324_v43, -inf  ;;  %v248_v56 = vmul.f32 %v1125_v11, %v221_v39  ;;  %v249_v58 = vmul.f32 %v1125_v11, %v222_v40  ;;  %v303_v59 = vmul.f32 %v718_v41, %v1127_v12 }
  0x5d   : > { %384 = vmax.xlane.f32.xlu1 %v383_v42  ;;  %v386_v63 = vmax.f32 %v1226_v29, %v1253_v55  ;;  %v1265_v0 = vsel %vm341_vm0, %v326_v49, -inf  ;;  %v1267_v1 = vadd.f32 %v301_v50, %v246_v44  ;;  %v328_v2 = vadd.f32 %v302_v51, %v247_v45 }
  0x5e   : > { %v389_v7 = vmax.f32 %v1245_v48, %v1265_v0  ;;  %v304_v8 = vmul.f32 %v719_v52, %v1127_v12  ;;  %v1274_v9 = vadd.f32 %v303_v59, %v248_v56  ;;  %v250_v10 = vmul.f32 %v1125_v11, %v223_v54 }
  0x5f   : > { %387 = vmax.xlane.f32.xlu0 %v386_v63  ;;  %v1281_v16 = vsel %vm341_vm0, %v328_v2, -inf  ;;  %v251_v17 = vmul.f32 %v1125_v11, %v224_v60  ;;  %v305_v18 = vmul.f32 %v720_v61, %v1127_v12  ;;  %v306_v19 = vmul.f32 %v721_v62, %v1127_v12 }
  0x60   : > { %v392_v25 = vmax.f32 %v1267_v1, %v1281_v16  ;;  %v330_v26 = vadd.f32 %v304_v8, %v249_v58  ;;  %v252_v27 = vmul.f32 %v1125_v11, %v225_v3  ;;  %v253_v30 = vmul.f32 %v1125_v11, %v226_v5 }
  0x61   : > { %390 = vmax.xlane.f32.xlu1 %v389_v7  ;;  %v1293_v31 = vadd.f32 %v305_v18, %v250_v10  ;;  %v332_v33 = vadd.f32 %v306_v19, %v251_v17  ;;  %v307_v35 = vmul.f32 %v722_v14, %v1127_v12  ;;  %v308_v36 = vmul.f32 %v723_v15, %v1127_v12 }
  0x62   : > { %v1300_v39 = vsel %vm341_vm0, %v330_v26, -inf  ;;  %v254_v40 = vmul.f32 %v1125_v11, %v227_v20  ;;  %v255_v41 = vmul.f32 %v1125_v11, %v228_v23  ;;  %v309_v42 = vmul.f32 %v724_v24, %v1127_v12 }
  0x63   : > { %393 = vmax.xlane.f32.xlu0 %v392_v25  ;;  %v395_v43 = vmax.f32 %v1274_v9, %v1300_v39  ;;  %v1309_v44 = vsel %vm341_vm0, %v332_v33, -inf  ;;  %v1311_v45 = vadd.f32 %v307_v35, %v252_v27  ;;  %v334_v49 = vadd.f32 %v308_v36, %v253_v30 }
  0x64   : > { %v398_v50 = vmax.f32 %v1293_v31, %v1309_v44  ;;  %v310_v51 = vmul.f32 %v725_v37, %v1127_v12  ;;  %v1320_v52 = vadd.f32 %v309_v42, %v254_v40 }
  0x65   : > { %396 = vmax.xlane.f32.xlu1 %v395_v43  ;;  %v1318_v11 = vsel %vm341_vm0, %v334_v49, -inf }
  0x66   : > { %v401_v54 = vmax.f32 %v1311_v45, %v1318_v11  ;;  %v336_v56 = vadd.f32 %v310_v51, %v255_v41 }
  0x67   : > { %399 = vmax.xlane.f32.xlu0 %v398_v50 }
  0x68   : > { %v1326_v58 = vsel %vm341_vm0, %v336_v56, -inf }
  0x69   : > { %402 = vmax.xlane.f32.xlu1 %v401_v54  ;;  %v404_v12 = vmax.f32 %v1320_v52, %v1326_v58 }
  0x6b   : > { %405 = vmax.xlane.f32.xlu0 %v404_v12 }
  0xe0   : > { %v370_v59 = vpop.xlane.xlu0 %369 }
  0xe1   : > { %v407_v60 = vsub.f32 %v1145_v28, %v370_v59  ;;  %v408_v61 = vsub.f32 %v1157_v38, %v370_v59  ;;  %v376_v62 = vpop.xlane.xlu1 %375 }
  0xe2   : > { %v411_v63 = vsub.f32 %v1149_v32, %v376_v62  ;;  %v412_v2 = vsub.f32 %v1169_v46, %v376_v62 }
  0xe3   : > { %v433_v3 = vmul.f32 1.442695, %v407_v60  ;;  %v435_v5 = vmul.f32 1.442695, %v408_v61 }
  0xe4   : > { %v441_v6 = vmul.f32 1.442695, %v411_v63  ;;  %v443_v7 = vmul.f32 1.442695, %v412_v2  ;;  %v373_v8 = vpop.xlane.xlu0 %372 }
  0xe5   : > { %806 = vpow2.f32 %v433_v3  ;;  %v409_v10 = vsub.f32 %v1171_v47, %v373_v8  ;;  %v410_v14 = vsub.f32 %v1185_v57, %v373_v8 }
  0xe6   : > { %808 = vpow2.f32 %v435_v5  ;;  %v379_v15 = vpop.xlane.xlu1 %378 }
  0xe7   : > { %810 = vpow2.f32 %v441_v6  ;;  %v437_v28 = vmul.f32 1.442695, %v409_v10  ;;  %v439_v38 = vmul.f32 1.442695, %v410_v14  ;;  %v413_v17 = vsub.f32 %v1178_v53, %v379_v15 }
  0xe8   : > { %812 = vpow2.f32 %v443_v7  ;;  %v414_v32 = vsub.f32 %v1205_v13, %v379_v15  ;;  %v382_v46 = vpop.xlane.xlu0 %381 }
  0xe9   : > { %814 = vpow2.f32 %v437_v28  ;;  %v445_v18 = vmul.f32 1.442695, %v413_v17  ;;  %v415_v19 = vsub.f32 %v1197_v4, %v382_v46  ;;  %v416_v20 = vsub.f32 %v1217_v21, %v382_v46 }
  0xea   : > { %816 = vpow2.f32 %v439_v38  ;;  %v447_v47 = vmul.f32 1.442695, %v414_v32  ;;  %v385_v57 = vpop.xlane.xlu1 %384 }
  0xeb   : > { %818 = vpow2.f32 %v445_v18  ;;  %v449_v23 = vmul.f32 1.442695, %v415_v19  ;;  %v451_v24 = vmul.f32 1.442695, %v416_v20  ;;  %v417_v25 = vsub.f32 %v1219_v22, %v385_v57 }
  0xec   : > { %820 = vpow2.f32 %v447_v47  ;;  %v418_v53 = vsub.f32 %v1233_v34, %v385_v57  ;;  %v388_v26 = vpop.xlane.xlu0 %387 }
  0xed   : > { %822 = vpow2.f32 %v449_v23  ;;  %v453_v13 = vmul.f32 1.442695, %v417_v25  ;;  %v419_v27 = vsub.f32 %v1226_v29, %v388_v26  ;;  %v420_v4 = vsub.f32 %v1253_v55, %v388_v26 }
  0xee   : > { %824 = vpow2.f32 %v451_v24  ;;  %v455_v21 = vmul.f32 1.442695, %v418_v53  ;;  %v391_v30 = vpop.xlane.xlu1 %390 }
  0xef   : > { %v1344_v33 = vpop.eup %806  ;;  %826 = vpow2.f32 %v453_v13  ;;  %v457_v35 = vmul.f32 1.442695, %v419_v27  ;;  %v459_v36 = vmul.f32 1.442695, %v420_v4  ;;  %v421_v22 = vsub.f32 %v1245_v48, %v391_v30 }
  0xf0   : > { %v1347_v37 = vpop.eup %808  ;;  %828 = vpow2.f32 %v455_v21  ;;  %v422_v34 = vsub.f32 %v1265_v0, %v391_v30  ;;  %v394_v40 = vpop.xlane.xlu0 %393 }
  0xf1   : > { %v1350_v41 = vpop.eup %810  ;;  %830 = vpow2.f32 %v457_v35  ;;  %v461_v29 = vmul.f32 1.442695, %v421_v22  ;;  %v423_v55 = vsub.f32 %v1267_v1, %v394_v40  ;;  %v424_v42 = vsub.f32 %v1281_v16, %v394_v40 }
  0xf2   : > { %v1354_v43 = vpop.eup %812  ;;  %832 = vpow2.f32 %v459_v36  ;;  %v463_v49 = vmul.f32 1.442695, %v422_v34  ;;  %v485_v48 = vadd.f32 %v1347_v37, %v1344_v33  ;;  %v397_v50 = vpop.xlane.xlu1 %396 }
  0xf3   : > { %v1358_v51 = vpop.eup %814  ;;  %834 = vpow2.f32 %v461_v29  ;;  %v465_v0 = vmul.f32 1.442695, %v423_v55  ;;  %v467_v54 = vmul.f32 1.442695, %v424_v42  ;;  %v425_v56 = vsub.f32 %v1274_v9, %v397_v50 }
  0xf4   : > { %v1361_v12 = vpop.eup %816  ;;  %836 = vpow2.f32 %v463_v49  ;;  %486 = vadd.xlane.f32.xlu1 %v485_v48  ;;  %v426_v1 = vsub.f32 %v1300_v39, %v397_v50  ;;  %v400_v16 = vpop.xlane.xlu0 %399  ;;  %v491_v59 = vadd.f32 %v1354_v43, %v1350_v41 }
  0xf5   : > { %v1366_v60 = vpop.eup %818  ;;  %838 = vpow2.f32 %v465_v0  ;;  %v469_v61 = vmul.f32 1.442695, %v425_v56  ;;  %v427_v62 = vsub.f32 %v1293_v31, %v400_v16  ;;  %v428_v63 = vsub.f32 %v1309_v44, %v400_v16 }
  0xf6   : > { %v1370_v2 = vpop.eup %820  ;;  %840 = vpow2.f32 %v467_v54  ;;  %v471_v9 = vmul.f32 1.442695, %v426_v1  ;;  %v488_v3 = vadd.f32 %v1361_v12, %v1358_v51  ;;  %v403_v39 = vpop.xlane.xlu1 %402 }
  0xf7   : > { %v1374_v5 = vpop.eup %822  ;;  %842 = vpow2.f32 %v469_v61  ;;  %v473_v6 = vmul.f32 1.442695, %v427_v62  ;;  %v475_v7 = vmul.f32 1.442695, %v428_v63  ;;  %v429_v8 = vsub.f32 %v1311_v45, %v403_v39 }
  0xf8   : > { %v1377_v10 = vpop.eup %824  ;;  %844 = vpow2.f32 %v471_v9  ;;  %492 = vadd.xlane.f32.xlu1 %v491_v59  ;;  %489 = vadd.xlane.f32.xlu0 %v488_v3  ;;  %v430_v31 = vsub.f32 %v1318_v11, %v403_v39  ;;  %v406_v44 = vpop.xlane.xlu0 %405  ;;  %v494_v14 = vadd.f32 %v1370_v2, %v1366_v60 }
  0xf9   : > { %v1382_v15 = vpop.eup %826  ;;  %846 = vpow2.f32 %v473_v6  ;;  %v477_v28 = vmul.f32 1.442695, %v429_v8  ;;  %v431_v38 = vsub.f32 %v1320_v52, %v406_v44  ;;  %v432_v17 = vsub.f32 %v1326_v58, %v406_v44 }
  0xfa   : > { %v1386_v45 = vpop.eup %828  ;;  %848 = vpow2.f32 %v475_v7  ;;  %v479_v32 = vmul.f32 1.442695, %v430_v31  ;;  %v497_v46 = vadd.f32 %v1377_v10, %v1374_v5 }
  0xfb   : > { %v1390_v11 = vpop.eup %830  ;;  %850 = vpow2.f32 %v477_v28  ;;  %v481_v18 = vmul.f32 1.442695, %v431_v38  ;;  %v483_v19 = vmul.f32 1.442695, %v432_v17  ;;  %v500_v52 = vadd.f32 %v1386_v45, %v1382_v15 }
  0xfc   : > { %v1392_v20 = vpop.eup %832  ;;  %852 = vpow2.f32 %v479_v32  ;;  %495 = vadd.xlane.f32.xlu0 %v494_v14  ;;  %498 = vadd.xlane.f32.xlu1 %v497_v46 }
  0xfd   : > { %v1396_v58 = vpop.eup %834  ;;  %854 = vpow2.f32 %v481_v18  ;;  %v503_v47 = vadd.f32 %v1392_v20, %v1390_v11 }
  0xfe   : > { %v1400_v57 = vpop.eup %836  ;;  %856 = vpow2.f32 %v483_v19 }
  0xff   : > { %v1402_v23 = vpop.eup %838  ;;  %v506_v25 = vadd.f32 %v1400_v57, %v1396_v58 }
 0x100   : > { %v1404_v24 = vpop.eup %840  ;;  %501 = vadd.xlane.f32.xlu0 %v500_v52  ;;  %504 = vadd.xlane.f32.xlu1 %v503_v47 }
 0x101   : > { %v1408_v53 = vpop.eup %842  ;;  %v509_v26 = vadd.f32 %v1404_v24, %v1402_v23 }
 0x102   : > { %v1412_v13 = vpop.eup %844 }
 0x103   : > { %v1414_v27 = vpop.eup %846  ;;  %v512_v21 = vadd.f32 %v1412_v13, %v1408_v53 }
 0x104   : > { %v1416_v4 = vpop.eup %848  ;;  %507 = vadd.xlane.f32.xlu0 %v506_v25  ;;  %510 = vadd.xlane.f32.xlu1 %v509_v26 }
 0x105   : > { %v1420_v30 = vpop.eup %850  ;;  %v515_v35 = vadd.f32 %v1416_v4, %v1414_v27 }
 0x106   : > { %v1424_v36 = vpop.eup %852 }
 0x107   : > { %v1426_v22 = vpop.eup %854  ;;  %v518_v40 = vadd.f32 %v1424_v36, %v1420_v30 }
 0x108   : > { %v1428_v34 = vpop.eup %856  ;;  %513 = vadd.xlane.f32.xlu0 %v512_v21  ;;  %516 = vadd.xlane.f32.xlu1 %v515_v35 }
 0x109   : > { %v521_v29 = vadd.f32 %v1428_v34, %v1426_v22 }
 0x10c   : > { %519 = vadd.xlane.f32.xlu0 %v518_v40  ;;  %522 = vadd.xlane.f32.xlu1 %v521_v29 }
 0x181   : > { %v487_v55 = vpop.xlane.xlu1 %486 }
 0x182   : > { %858 = vrcp.f32 %v487_v55 }
 0x185   : > { %v493_v42 = vpop.xlane.xlu1 %492  ;;  %v490_v49 = vpop.xlane.xlu0 %489 }
 0x186   : > { %860 = vrcp.f32 %v493_v42 }
 0x187   : > { %862 = vrcp.f32 %v490_v49 }
 0x189   : > { %v499_v48 = vpop.xlane.xlu1 %498  ;;  %v496_v50 = vpop.xlane.xlu0 %495 }
 0x18a   : > { %864 = vrcp.f32 %v499_v48 }
 0x18b   : > { %866 = vrcp.f32 %v496_v50 }
 0x18c   : > { %v859_v0 = vpop.eup %858 }
 0x18d   : > { %v525_v54 = vmul.f32 %v859_v0, %v1344_v33  ;;  %v526_v56 = vmul.f32 %v859_v0, %v1347_v37  ;;  %v505_v1 = vpop.xlane.xlu1 %504  ;;  %v502_v16 = vpop.xlane.xlu0 %501 }
 0x18e   : > { %868 = vrcp.f32 %v505_v1 }
 0x18f   : > { %563 = vst [vmem:[%s1437_s25] sm:$0xff] %v525_v54  ;;  %564 = vst [vmem:[%s1437_s25 + $0x8] sm:$0xff] %v526_v56  ;;  %870 = vrcp.f32 %v502_v16 }
 0x190   : > { %v861_v59 = vpop.eup %860 }
 0x191   : > { %v863_v61 = vpop.eup %862  ;;  %v531_v33 = vmul.f32 %v861_v59, %v1350_v41  ;;  %v532_v37 = vmul.f32 %v861_v59, %v1354_v43  ;;  %v511_v62 = vpop.xlane.xlu1 %510 }
 0x192   : > { %v508_v63 = vpop.xlane.xlu0 %507  ;;  %v528_v9 = vmul.f32 %v863_v61, %v1358_v51  ;;  %v529_v3 = vmul.f32 %v863_v61, %v1361_v12  ;;  %872 = vrcp.f32 %v511_v62 }
 0x193   : > { %567 = vst [vmem:[%s1437_s25 + $0x20] sm:$0xff] %v531_v33  ;;  %568 = vst [vmem:[%s1437_s25 + $0x28] sm:$0xff] %v532_v37  ;;  %874 = vrcp.f32 %v508_v63 }
 0x194   : > { %v865_v39 = vpop.eup %864  ;;  %565 = vst [vmem:[%s1437_s25 + $0x10] sm:$0xff] %v528_v9  ;;  %566 = vst [vmem:[%s1437_s25 + $0x18] sm:$0xff] %v529_v3 }
 0x195   : > { %v867_v41 = vpop.eup %866  ;;  %v537_v43 = vmul.f32 %v865_v39, %v1374_v5  ;;  %v538_v6 = vmul.f32 %v865_v39, %v1377_v10  ;;  %v517_v7 = vpop.xlane.xlu1 %516 }
 0x196   : > { %v514_v51 = vpop.xlane.xlu0 %513  ;;  %v534_v12 = vmul.f32 %v867_v41, %v1366_v60  ;;  %v535_v8 = vmul.f32 %v867_v41, %v1370_v2  ;;  %876 = vrcp.f32 %v517_v7 }
 0x197   : > { %571 = vst [vmem:[%s1437_s25 + $0x40] sm:$0xff] %v537_v43  ;;  %572 = vst [vmem:[%s1437_s25 + $0x48] sm:$0xff] %v538_v6  ;;  %878 = vrcp.f32 %v514_v51 }
 0x198   : > { %v869_v31 = vpop.eup %868  ;;  %569 = vst [vmem:[%s1437_s25 + $0x30] sm:$0xff] %v534_v12  ;;  %570 = vst [vmem:[%s1437_s25 + $0x38] sm:$0xff] %v535_v8 }
 0x199   : > { %v871_v5 = vpop.eup %870  ;;  %v543_v10 = vmul.f32 %v869_v31, %v1390_v11  ;;  %v544_v44 = vmul.f32 %v869_v31, %v1392_v20  ;;  %v523_v14 = vpop.xlane.xlu1 %522 }
 0x19a   : > { %v520_v60 = vpop.xlane.xlu0 %519  ;;  %v540_v2 = vmul.f32 %v871_v5, %v1382_v15  ;;  %v541_v28 = vmul.f32 %v871_v5, %v1386_v45  ;;  %880 = vrcp.f32 %v523_v14 }
 0x19b   : > { %575 = vst [vmem:[%s1437_s25 + $0x60] sm:$0xff] %v543_v10  ;;  %576 = vst [vmem:[%s1437_s25 + $0x68] sm:$0xff] %v544_v44  ;;  %882 = vrcp.f32 %v520_v60 }
 0x19c   : > { %v873_v38 = vpop.eup %872  ;;  %573 = vst [vmem:[%s1437_s25 + $0x50] sm:$0xff] %v540_v2  ;;  %574 = vst [vmem:[%s1437_s25 + $0x58] sm:$0xff] %v541_v28 }
 0x19d   : > { %v875_v17 = vpop.eup %874  ;;  %v549_v32 = vmul.f32 %v873_v38, %v1402_v23  ;;  %v550_v46 = vmul.f32 %v873_v38, %v1404_v24 }
 0x19e   : > { %v546_v15 = vmul.f32 %v875_v17, %v1396_v58  ;;  %v547_v45 = vmul.f32 %v875_v17, %v1400_v57 }
 0x19f   : > { %579 = vst [vmem:[%s1437_s25 + $0x80] sm:$0xff] %v549_v32  ;;  %580 = vst [vmem:[%s1437_s25 + $0x88] sm:$0xff] %v550_v46 }
 0x1a0   : > { %v877_v11 = vpop.eup %876  ;;  %577 = vst [vmem:[%s1437_s25 + $0x70] sm:$0xff] %v546_v15  ;;  %578 = vst [vmem:[%s1437_s25 + $0x78] sm:$0xff] %v547_v45 }
 0x1a1   : > { %v879_v18 = vpop.eup %878  ;;  %v555_v19 = vmul.f32 %v877_v11, %v1414_v27  ;;  %v556_v20 = vmul.f32 %v877_v11, %v1416_v4 }
 0x1a2   : > { %v552_v52 = vmul.f32 %v879_v18, %v1408_v53  ;;  %v553_v58 = vmul.f32 %v879_v18, %v1412_v13 }
 0x1a3   : > { %583 = vst [vmem:[%s1437_s25 + $0xa0] sm:$0xff] %v555_v19  ;;  %584 = vst [vmem:[%s1437_s25 + $0xa8] sm:$0xff] %v556_v20 }
 0x1a4   : > { %v881_v47 = vpop.eup %880  ;;  %581 = vst [vmem:[%s1437_s25 + $0x90] sm:$0xff] %v552_v52  ;;  %582 = vst [vmem:[%s1437_s25 + $0x98] sm:$0xff] %v553_v58 }
 0x1a5   : > { %v883_v57 = vpop.eup %882  ;;  %v561_v23 = vmul.f32 %v881_v47, %v1426_v22  ;;  %v562_v24 = vmul.f32 %v881_v47, %v1428_v34 }
 0x1a6   : > { %v558_v25 = vmul.f32 %v883_v57, %v1420_v30  ;;  %v559_v53 = vmul.f32 %v883_v57, %v1424_v36 }
 0x1a7   : > { %587 = vst [vmem:[%s1437_s25 + $0xc0] sm:$0xff] %v561_v23  ;;  %588 = vst [vmem:[%s1437_s25 + $0xc8] sm:$0xff] %v562_v24 }
 0x1a8   : > { %585 = vst [vmem:[%s1437_s25 + $0xb0] sm:$0xff] %v558_v25  ;;  %586 = vst [vmem:[%s1437_s25 + $0xb8] sm:$0xff] %v559_v53 }
 0x1a9   : > { %910 = shalt.err (!%p907_p3)
}
 0x1aa   : > { %s911_s8 = scalar_lea.hbm %s1488_s29, 3328  ;;  %s915_s17 = scalar_lea.hbm %s1542_s2, 6656 }
 0x1ab   : > { %p912_p7 = scmp.ne.s32.totalorder %s1488_s29, %s911_s8  ;;  %p916_p10 = scmp.lt.u32.totalorder %s1488_s29, %s1542_s2 }
 0x1ac   : > { %p917_p4 = scmp.lt.u32.totalorder %s915_s17, %s911_s8  ;;  %p919_p6 = scmp.lt.u32.totalorder %s911_s8, %s1488_s29 }
 0x1ad   : > { %p913_p8 = pnand %p912_p7, %p1046_p11 }
 0x1ae   : > { %p918_p5 = por %p917_p4, %p916_p10 }
 0x1af   : > { %p914_p9 = pneg %p913_p8 }
 0x1b0   : > { %p920_p13 = por %p919_p6, %p918_p5 }
 0x1b2   : > { %p921_p2 = pnand %p920_p13, %p914_p9 }
 0x1b4   : > { %924 = shalt.err (!%p921_p2)
}
 0x1b5   : > { %s977_s24 = smov 256   ;;  %s978_s20 = smov 16  }
 0x1b6   : > { %752 = dma.vmem_to_hbm [thread:$0]  (%p1046_p11), %s1490_s27, 3328, %s1488_s29, %s590_s30, %s977_s24, %s977_s24, %s978_s20  }
 0x1b7 PF: > { %s619_s25 = sand.u32 1, %s955_s9   ;;  %p759_p0 = pnand %p692_p1, %p1050_p12 }
 0x1b8   : > { %s620_s26 = scalar_lea.sflag [#allocation4], %s619_s25 }
 0x1b9   : > { %950 = dma.done.wait (!%p759_p0), %s620_s26, 3328  }
 0x1ba   : > { %952 = vsyncadd (!%p759_p0), %s620_s26, 4294963968  ;;  %p16_p3 = scmp.ge.s32.totalorder %s1019_s15, 4   ;;  %s1548_s9 = smov %s959_s10 }
 0x1bb   : > { %s1549_s10 = smov %s963_s11  ;;  %s1550_s11 = smov %s1031_s18 }
 0x1bc   : > { %s1551_s12 = smov %s1019_s15  ;;  %18 = sbr.rel (!%p16_p3) target bundleno = 6 (0x6), region = 84 }
 0x1c3   :  { %625 = vsyncpa [#allocation3], 1 }
 0x1c4   :  { %627 = vsyncpa [#allocation3 + $0x1], 1 }
 0x1c5   :  { %628 = vsyncpa [#allocation4], 1 }
 0x1c6   :  { %630 = vsyncpa [#allocation4 + $0x1], 1 }
 0x1c7   :  { %631 = vsyncpa [#allocation5], 1 }
 0x1c8   :  { %633 = vsyncpa [#allocation5 + $0x1], 1 }

</bundles_post_ra>
